<compile_context>
chip_gen: v7x
topology: tpu7x:2x2x1
jax: 0.10.0
libtpu: 0.0.40
codegen_flags: <defaults>
</compile_context>

<pallas_src>
import jax
import jax.numpy as jnp
from jax.experimental import pallas as pl
from jax.experimental.pallas import tpu as pltpu

HIDDEN_SIZE = 128
_TB_CAP = 4096          # VMEM-safe rows per block (well under 32 MiB scoped VMEM)
_BF16_MIN_BATCH = 2048  # bf16 MXU operands only pay off once batch is in the thousands


def _num_tensorcores():
    """TensorCores per JAX device: 2 on v7x / megacore chips, else 1."""
    try:
        kind = jax.devices()[0].device_kind.lower()
    except Exception:
        return 1
    for tag in ("v7", "v5p", "v4"):
        if tag in kind:
            return 2
    return 1


def _make_mlp_kernel(use_bf16):
    cdt = jnp.bfloat16 if use_bf16 else jnp.float32

    def kernel(x_ref, w1_ref, b1_ref, w2_ref, b2_ref, o_ref):
        # hidden = relu(x @ W1 + b1): MXU matmul (f32 accumulate), f32 VPU epilogue.
        h = jnp.dot(x_ref[...].astype(cdt), w1_ref[...].astype(cdt),
                    preferred_element_type=jnp.float32)
        h = jnp.maximum(h + b1_ref[...], 0.0)
        # logits = hidden @ W2 + b2, written unpadded as (tb, n_actions).
        out = jnp.dot(h.astype(cdt), w2_ref[...].astype(cdt),
                      preferred_element_type=jnp.float32)
        o_ref[...] = (out + b2_ref[...]).astype(o_ref.dtype)

    return kernel


def _choose_tiling(B, n_cores):
    """One block per TensorCore when it fits VMEM; otherwise a round-to-8 cap."""
    tb = min(pl.cdiv(B, n_cores), _TB_CAP)
    if tb >= B:
        return B, (1,)                      # single block == full array (tiling exemption)
    tb = ((tb + 7) // 8) * 8                # second-last block dim must be a multiple of 8
    if tb >= B:
        return B, (1,)
    return tb, (pl.cdiv(B, tb),)


def mlp_forward(x, w1, b1, w2, b2, *, use_bf16=None):
    """x: (B, input_size) f32; returns (B, n_actions) f32 == relu(x@W1+b1)@W2+b2."""
    B, K = x.shape
    H = w1.shape[1]
    N = w2.shape[1]

    if use_bf16 is None:
        use_bf16 = B >= _BF16_MIN_BATCH

    tb, grid = _choose_tiling(B, _num_tensorcores())

    itemsize = jnp.dtype(jnp.float32).itemsize
    flops = 2 * B * (K * H + H * N)
    bytes_accessed = itemsize * (x.size + w1.size + b1.size + w2.size + b2.size + B * N)

    return pl.pallas_call(
        _make_mlp_kernel(use_bf16),
        out_shape=jax.ShapeDtypeStruct((B, N), jnp.float32),
        grid=grid,
        in_specs=[
            pl.BlockSpec((tb, K), lambda i: (i, 0)),   # activations stream
            pl.BlockSpec((K, H), lambda i: (0, 0)),    # weights stay VMEM-resident
            pl.BlockSpec((1, H), lambda i: (0, 0)),
            pl.BlockSpec((H, N), lambda i: (0, 0)),
            pl.BlockSpec((1, N), lambda i: (0, 0)),
        ],
        out_specs=pl.BlockSpec((tb, N), lambda i: (i, 0)),
        compiler_params=pltpu.CompilerParams(
            dimension_semantics=("parallel",)),
        cost_estimate=pl.CostEstimate(
            flops=flops, transcendentals=0, bytes_accessed=bytes_accessed),
    )(x, w1, b1, w2, b2)


def init_params(key, input_size, n_actions):
    """Deterministic parameter init (PyTorch nn.Linear-style uniform bounds)."""
    k1, k2, k3, k4 = jax.random.split(key, 4)
    bound1 = 1.0 / jnp.sqrt(input_size)
    bound2 = 1.0 / jnp.sqrt(HIDDEN_SIZE)
    # Stored as (in, out) == transposed relative to torch's (out, in).
    w1 = jax.random.uniform(k1, (input_size, HIDDEN_SIZE), jnp.float32, -bound1, bound1)
    b1 = jax.random.uniform(k2, (1, HIDDEN_SIZE), jnp.float32, -bound1, bound1)
    w2 = jax.random.uniform(k3, (HIDDEN_SIZE, n_actions), jnp.float32, -bound2, bound2)
    b2 = jax.random.uniform(k4, (1, n_actions), jnp.float32, -bound2, bound2)
    return w1, b1, w2, b2


if __name__ == "__main__":
    key = jax.random.PRNGKey(0)
    input_size, n_actions = 4, 2       # CartPole-like observation/action sizes
    kp, kx1, kx2, kx3 = jax.random.split(key, 4)
    w1, b1, w2, b2 = init_params(kp, input_size, n_actions)

    def ref_fwd(xx):
        return jnp.maximum(xx @ w1 + b1, 0.0) @ w2 + b2

    fwd = jax.jit(lambda xx: mlp_forward(xx, w1, b1, w2, b2))

    # 1) Batched (vectorized-env) observations: f32 path, exact parity.
    x = jax.random.normal(kx1, (512, input_size), jnp.float32)
    out = fwd(x)
    jax.block_until_ready(out)
    assert out.shape == (512, n_actions)
    assert jnp.allclose(out, ref_fwd(x), atol=1e-5, rtol=1e-5)

    # 2) Odd, tiny batch (exercises the single-block full-array path).
    x_small = jax.random.normal(kx2, (5, input_size), jnp.float32)
    out_small = fwd(x_small)
    jax.block_until_ready(out_small)
    assert out_small.shape == (5, n_actions)
    assert jnp.allclose(out_small, ref_fwd(x_small), atol=1e-5, rtol=1e-5)

    # 3) Large batch: bf16 MXU operands auto-enabled, f32 accumulation (looser tol).
    x_big = jax.random.normal(kx3, (2048, input_size), jnp.float32)
    out_big = fwd(x_big)
    jax.block_until_ready(out_big)
    assert out_big.shape == (2048, n_actions)
    assert jnp.allclose(out_big, ref_fwd(x_big), atol=5e-2, rtol=5e-2)

    print("KERNEL_OK")
</pallas_src>

<mosaic_0001>
module attributes {stable_mosaic.version = 11 : i64} {
  func.func @kernel(%arg0: i32, %arg1: memref<512x4xf32, #tpu.memory_space<vmem>>, %arg2: memref<4x128xf32, #tpu.memory_space<vmem>>, %arg3: memref<1x128xf32, #tpu.memory_space<vmem>>, %arg4: memref<128x2xf32, #tpu.memory_space<vmem>>, %arg5: memref<1x2xf32, #tpu.memory_space<vmem>>, %arg6: memref<512x2xf32, #tpu.memory_space<vmem>>) attributes {dimension_semantics = [#tpu.dimension_semantics<parallel>], iteration_bounds = array<i64: 1>, scalar_prefetch = 0 : i64, scratch_operands = 0 : i64, tpu.core_type = #tpu.core_type<tc>, window_params = [{transform_indices = @transform_0, window_bounds = array<i64: 512, 4>}, {pipeline_mode = #tpu.pipeline_mode<synchronous>, transform_indices = @transform_1, window_bounds = array<i64: 4, 128>}, {pipeline_mode = #tpu.pipeline_mode<synchronous>, transform_indices = @transform_2, window_bounds = array<i64: 1, 128>}, {pipeline_mode = #tpu.pipeline_mode<synchronous>, transform_indices = @transform_3, window_bounds = array<i64: 128, 2>}, {pipeline_mode = #tpu.pipeline_mode<synchronous>, transform_indices = @transform_4, window_bounds = array<i64: 1, 2>}, {transform_indices = @transform_5, window_bounds = array<i64: 512, 2>}]} {
    %c0 = arith.constant 0 : index
    %c0_0 = arith.constant 0 : index
    %0 = vector.load %arg1[%c0, %c0_0] : memref<512x4xf32, #tpu.memory_space<vmem>>, vector<512x4xf32>
    %c0_1 = arith.constant 0 : index
    %c0_2 = arith.constant 0 : index
    %1 = vector.load %arg2[%c0_1, %c0_2] : memref<4x128xf32, #tpu.memory_space<vmem>>, vector<4x128xf32>
    %cst = arith.constant dense<0.000000e+00> : vector<512x128xf32>
    %2 = tpu.matmul %0, %1, %cst {dimension_numbers = #tpu.dot_dimension_numbers<[1], [0], [0], [1], [0, 0, 1, 1], [], []>} : vector<512x4xf32>, vector<4x128xf32>, vector<512x128xf32> -> vector<512x128xf32>
    %c0_3 = arith.constant 0 : index
    %c0_4 = arith.constant 0 : index
    %3 = vector.load %arg3[%c0_3, %c0_4] : memref<1x128xf32, #tpu.memory_space<vmem>>, vector<1x128xf32>
    %4 = vector.broadcast %3 : vector<1x128xf32> to vector<512x128xf32>
    %5 = arith.addf %2, %4 : vector<512x128xf32>
    %cst_5 = arith.constant 0.000000e+00 : f32
    %6 = vector.broadcast %cst_5 : f32 to vector<512x128xf32>
    %7 = arith.maximumf %5, %6 : vector<512x128xf32>
    %c0_6 = arith.constant 0 : index
    %c0_7 = arith.constant 0 : index
    %8 = vector.load %arg4[%c0_6, %c0_7] : memref<128x2xf32, #tpu.memory_space<vmem>>, vector<128x2xf32>
    %cst_8 = arith.constant dense<0.000000e+00> : vector<512x2xf32>
    %9 = tpu.matmul %7, %8, %cst_8 {dimension_numbers = #tpu.dot_dimension_numbers<[1], [0], [0], [1], [0, 0, 1, 1], [], []>} : vector<512x128xf32>, vector<128x2xf32>, vector<512x2xf32> -> vector<512x2xf32>
    %c0_9 = arith.constant 0 : index
    %c0_10 = arith.constant 0 : index
    %10 = vector.load %arg5[%c0_9, %c0_10] : memref<1x2xf32, #tpu.memory_space<vmem>>, vector<1x2xf32>
    %11 = vector.broadcast %10 : vector<1x2xf32> to vector<512x2xf32>
    %12 = arith.addf %9, %11 : vector<512x2xf32>
    %c0_11 = arith.constant 0 : index
    %c0_12 = arith.constant 0 : index
    %13 = vector.load %arg6[%c0_11, %c0_12] : memref<512x2xf32, #tpu.memory_space<vmem>>, vector<512x2xf32>
    tpu.vector_store %arg6[%c0_11, %c0_12], %12 {strides = array<i32>} : memref<512x2xf32, #tpu.memory_space<vmem>>, vector<512x2xf32>,
    return
  }
  func.func @transform_0(%arg0: i32) -> (i32, i32) {
    %c0_i32 = arith.constant 0 : i32
    %c0_i32_0 = arith.constant 0 : i32
    return %arg0, %c0_i32 : i32, i32
  }
  func.func @transform_1(%arg0: i32) -> (i32, i32) {
    %c0_i32 = arith.constant 0 : i32
    %c0_i32_0 = arith.constant 0 : i32
    %c0_i32_1 = arith.constant 0 : i32
    return %c0_i32, %c0_i32_0 : i32, i32
  }
  func.func @transform_2(%arg0: i32) -> (i32, i32) {
    %c0_i32 = arith.constant 0 : i32
    %c0_i32_0 = arith.constant 0 : i32
    %c0_i32_1 = arith.constant 0 : i32
    return %c0_i32, %c0_i32_0 : i32, i32
  }
  func.func @transform_3(%arg0: i32) -> (i32, i32) {
    %c0_i32 = arith.constant 0 : i32
    %c0_i32_0 = arith.constant 0 : i32
    %c0_i32_1 = arith.constant 0 : i32
    return %c0_i32, %c0_i32_0 : i32, i32
  }
  func.func @transform_4(%arg0: i32) -> (i32, i32) {
    %c0_i32 = arith.constant 0 : i32
    %c0_i32_0 = arith.constant 0 : i32
    %c0_i32_1 = arith.constant 0 : i32
    return %c0_i32, %c0_i32_0 : i32, i32
  }
  func.func @transform_5(%arg0: i32) -> (i32, i32) {
    %c0_i32 = arith.constant 0 : i32
    %c0_i32_0 = arith.constant 0 : i32
    return %arg0, %c0_i32 : i32, i32
  }
}

</mosaic_0001>

<bundles_post_ra>
// kernel: _lambda_.1
= control target key start
LH: loop header
LB: loop body
LE: loop exit
PB: predicated region body
PF: predicated region fallthrough
CT: control target
= control target key end

     0   :  { %vm285_vm0 = vcmask 1043456   ;;  %vm92_vm1 = vcmask 31744   ;;  %vm1146_vm2 = vcmask 15360   ;;  %s2432_s1 = inlined_call_operand.vmem [shape: f32[4,128], index: 1, kind: input, shape index: {}]   ;;  %s2433_s0 = inlined_call_operand.vmem [shape: f32[512,4], index: 0, kind: input, shape index: {}]   ;;  %s2434_s3 = inlined_call_operand.vmem [shape: f32[128,2], index: 3, kind: input, shape index: {}]   ;;  %s2435_s2 = inlined_call_operand.vmem [shape: f32[1,128], index: 2, kind: input, shape index: {}]   ;;  %s2436_s4 = inlined_call_operand.vmem [shape: f32[1,2], index: 4, kind: input, shape index: {}]   ;;  %s2437_s5 = inlined_call_operand.vmem [shape: f32[512,2], index: 5, kind: output, shape index: {}]  }
   0x1   :  { %v84_v0 = vld [vmem:[%s2432_s1] sm:$0xf]  ;;  %v21_v2 = vld [vmem:[%s2433_s0 + $0x8] sm:$0xff]  ;;  %v22_v3 = vld [vmem:[%s2433_s0 + $0x10] sm:$0xff] }
   0x2   :  { %v20_v1 = vld [vmem:[%s2433_s0] sm:$0xff]  ;;  %1427 = vmatprep.subr.msk.mxu0 %vm285_vm0, %v84_v0  ;;  %v23_v4 = vld [vmem:[%s2433_s0 + $0x18] sm:$0xff]  ;;  %v25_v6 = vld [vmem:[%s2433_s0 + $0x28] sm:$0xff] }
   0x3   :  { %1429 = vmatprep.mubr.msk.f32.mxu0 %vm92_vm1, %v20_v1  ;;  %1428 = vmatpush3.msk.msra.mxu0 %vm285_vm0, %v84_v0  ;;  %v24_v5 = vld [vmem:[%s2433_s0 + $0x20] sm:$0xff]  ;;  %v26_v7 = vld [vmem:[%s2433_s0 + $0x30] sm:$0xff]  ;;  %v27_v8 = vld [vmem:[%s2433_s0 + $0x38] sm:$0xff] }
   0x4   :  { %1430 = vmatmul.mubr.msk.f32.vlgmr.msra.gmra.mrb[0].mxu0 %vm92_vm1, %v21_v2  ;;  %v28_v9 = vld [vmem:[%s2433_s0 + $0x40] sm:$0xff]  ;;  %v29_v10 = vld [vmem:[%s2433_s0 + $0x48] sm:$0xff]  ;;  %v30_v11 = vld [vmem:[%s2433_s0 + $0x50] sm:$0xff] }
   0x5   :  { %1432 = vmatprep.mubr.msk.f32.mxu0 %vm92_vm1, %v22_v3  ;;  %v31_v12 = vld [vmem:[%s2433_s0 + $0x58] sm:$0xff]  ;;  %v32_v13 = vld [vmem:[%s2433_s0 + $0x60] sm:$0xff]  ;;  %v739_v15 = vld [vmem:[%s2434_s3 + $0x8] sm:$0xff] }
   0x6   :  { %v738_v14 = vld [vmem:[%s2434_s3] sm:$0xff]  ;;  %v740_v16 = vld [vmem:[%s2434_s3 + $0x10] sm:$0xff]  ;;  %v741_v17 = vld [vmem:[%s2434_s3 + $0x18] sm:$0xff] }
   0x7   :  { %v1653_v18 = vpack.c.bf16 %v739_v15, %v738_v14  ;;  %v1657_v19 = vpack.c.bf16 %v741_v17, %v740_v16  ;;  %v33_v20 = vld [vmem:[%s2433_s0 + $0x68] sm:$0xff]  ;;  %v742_v21 = vld [vmem:[%s2434_s3 + $0x20] sm:$0xff]  ;;  %v34_v23 = vld [vmem:[%s2433_s0 + $0x70] sm:$0xff] }
   0x8   :  { %1433 = vmatmul.mubr.msk.f32.gmra.mrb[2].mxu0 %vm92_vm1, %v23_v4  ;;  %v743_v22 = vld [vmem:[%s2434_s3 + $0x28] sm:$0xff]  ;;  %v35_v25 = vld [vmem:[%s2433_s0 + $0x78] sm:$0xff]  ;;  %v744_v26 = vld [vmem:[%s2434_s3 + $0x30] sm:$0xff] }
   0x9   :  { %1435 = vmatprep.mubr.msk.f32.mxu0 %vm92_vm1, %v24_v5  ;;  %1654 = vmatprep.subr.bf16.mxu0 %v1653_v18  ;;  %v1661_v24 = vpack.c.bf16 %v743_v22, %v742_v21  ;;  %v745_v27 = vld [vmem:[%s2434_s3 + $0x38] sm:$0xff]  ;;  %v36_v28 = vld [vmem:[%s2433_s0 + $0x80] sm:$0xff]  ;;  %v37_v30 = vld [vmem:[%s2433_s0 + $0x88] sm:$0xff] }
   0xa   :  { %1685 = vmatprep.subr.bf16.mxu1 %v1653_v18  ;;  %1656 = vmatpush3.bf16.msra.mxu0 %v1653_v18  ;;  %v1665_v29 = vpack.c.bf16 %v745_v27, %v744_v26  ;;  %v746_v31 = vld [vmem:[%s2434_s3 + $0x40] sm:$0xff]  ;;  %v747_v32 = vld [vmem:[%s2434_s3 + $0x48] sm:$0xff]  ;;  %v38_v33 = vld [vmem:[%s2433_s0 + $0x90] sm:$0xff] }
   0xb   :  { %1693 = vmatpush3.bf16.msra.mxu1 %v1653_v18  ;;  %1658 = vmatprep.subr.bf16.mxu0 %v1657_v19  ;;  %v1669_v34 = vpack.c.bf16 %v747_v32, %v746_v31  ;;  %v39_v35 = vld [vmem:[%s2433_s0 + $0x98] sm:$0xff]  ;;  %v748_v36 = vld [vmem:[%s2434_s3 + $0x50] sm:$0xff]  ;;  %v40_v38 = vld [vmem:[%s2433_s0 + $0xa0] sm:$0xff] }
   0xc   :  { %1436 = vmatmul.mubr.msk.f32.gmra.mrb[4].mxu0 %vm92_vm1, %v25_v6  ;;  %1686 = vmatprep.subr.bf16.mxu1 %v1657_v19  ;;  %v749_v37 = vld [vmem:[%s2434_s3 + $0x58] sm:$0xff]  ;;  %v41_v40 = vld [vmem:[%s2433_s0 + $0xa8] sm:$0xff]  ;;  %v750_v41 = vld [vmem:[%s2434_s3 + $0x60] sm:$0xff] }
   0xd   :  { %1438 = vmatprep.mubr.msk.f32.mxu0 %vm92_vm1, %v26_v7  ;;  %v1673_v39 = vpack.c.bf16 %v749_v37, %v748_v36  ;;  %v751_v42 = vld [vmem:[%s2434_s3 + $0x68] sm:$0xff]  ;;  %v42_v43 = vld [vmem:[%s2433_s0 + $0xb0] sm:$0xff]  ;;  %v43_v45 = vld [vmem:[%s2433_s0 + $0xb8] sm:$0xff] }
   0xe   :  { %1660 = vmatpush3.bf16.msra.mxu0 %v1657_v19  ;;  %v1677_v44 = vpack.c.bf16 %v751_v42, %v750_v41  ;;  %v44_v46 = vld [vmem:[%s2433_s0 + $0xc0] sm:$0xff]  ;;  %v45_v47 = vld [vmem:[%s2433_s0 + $0xc8] sm:$0xff]  ;;  %v46_v48 = vld [vmem:[%s2433_s0 + $0xd0] sm:$0xff] }
   0xf   :  { %1694 = vmatpush3.bf16.msra.mxu1 %v1657_v19  ;;  %1662 = vmatprep.subr.bf16.mxu0 %v1661_v24  ;;  %v47_v49 = vld [vmem:[%s2433_s0 + $0xd8] sm:$0xff]  ;;  %v48_v50 = vld [vmem:[%s2433_s0 + $0xe0] sm:$0xff]  ;;  %v49_v51 = vld [vmem:[%s2433_s0 + $0xe8] sm:$0xff] }
  0x10   :  { %1439 = vmatmul.mubr.msk.f32.gmra.mrb[6].mxu0 %vm92_vm1, %v27_v8  ;;  %1687 = vmatprep.subr.bf16.mxu1 %v1661_v24  ;;  %v50_v52 = vld [vmem:[%s2433_s0 + $0xf0] sm:$0xff]  ;;  %v51_v53 = vld [vmem:[%s2433_s0 + $0xf8] sm:$0xff]  ;;  %v52_v54 = vld [vmem:[%s2433_s0 + $0x100] sm:$0xff] }
  0x11   :  { %1441 = vmatprep.mubr.msk.f32.mxu0 %vm92_vm1, %v28_v9  ;;  %v53_v55 = vld [vmem:[%s2433_s0 + $0x108] sm:$0xff]  ;;  %v54_v56 = vld [vmem:[%s2433_s0 + $0x110] sm:$0xff]  ;;  %v55_v57 = vld [vmem:[%s2433_s0 + $0x118] sm:$0xff] }
  0x12   :  { %1664 = vmatpush3.bf16.msra.mxu0 %v1661_v24  ;;  %v56_v58 = vld [vmem:[%s2433_s0 + $0x120] sm:$0xff]  ;;  %v57_v59 = vld [vmem:[%s2433_s0 + $0x128] sm:$0xff]  ;;  %v58_v60 = vld [vmem:[%s2433_s0 + $0x130] sm:$0xff] }
  0x13   :  { %1695 = vmatpush3.bf16.msra.mxu1 %v1661_v24  ;;  %1666 = vmatprep.subr.bf16.mxu0 %v1665_v29  ;;  %v59_v61 = vld [vmem:[%s2433_s0 + $0x138] sm:$0xff]  ;;  %v60_v62 = vld [vmem:[%s2433_s0 + $0x140] sm:$0xff]  ;;  %v61_v63 = vld [vmem:[%s2433_s0 + $0x148] sm:$0xff] }
  0x14   :  { %1442 = vmatmul.mubr.msk.f32.gmra.mrb[8].mxu0 %vm92_vm1, %v29_v10  ;;  %1688 = vmatprep.subr.bf16.mxu1 %v1665_v29  ;;  %v62_v0 = vld [vmem:[%s2433_s0 + $0x150] sm:$0xff]  ;;  %v63_v1 = vld [vmem:[%s2433_s0 + $0x158] sm:$0xff]  ;;  %v64_v2 = vld [vmem:[%s2433_s0 + $0x160] sm:$0xff] }
  0x15   :  { %1444 = vmatprep.mubr.msk.f32.mxu0 %vm92_vm1, %v30_v11  ;;  %v752_v3 = vld [vmem:[%s2434_s3 + $0x70] sm:$0xff]  ;;  %v753_v4 = vld [vmem:[%s2434_s3 + $0x78] sm:$0xff]  ;;  %v65_v6 = vld [vmem:[%s2433_s0 + $0x168] sm:$0xff] }
  0x16   :  { %1668 = vmatpush3.bf16.msra.mxu0 %v1665_v29  ;;  %v1681_v5 = vpack.c.bf16 %v753_v4, %v752_v3  ;;  %v66_v7 = vld [vmem:[%s2433_s0 + $0x170] sm:$0xff]  ;;  %v67_v8 = vld [vmem:[%s2433_s0 + $0x178] sm:$0xff]  ;;  %v68_v9 = vld [vmem:[%s2433_s0 + $0x180] sm:$0xff] }
  0x17   :  { %1696 = vmatpush3.bf16.msra.mxu1 %v1665_v29  ;;  %1670 = vmatprep.subr.bf16.mxu0 %v1669_v34  ;;  %v69_v10 = vld [vmem:[%s2433_s0 + $0x188] sm:$0xff]  ;;  %v70_v11 = vld [vmem:[%s2433_s0 + $0x190] sm:$0xff]  ;;  %v75_v16 = vld [vmem:[%s2433_s0 + $0x1b8] sm:$0xff] }
  0x18   :  { %1445 = vmatmul.mubr.msk.f32.gmra.mrb[10].mxu0 %vm92_vm1, %v31_v12  ;;  %1689 = vmatprep.subr.bf16.mxu1 %v1669_v34  ;;  %v71_v12 = vld [vmem:[%s2433_s0 + $0x198] sm:$0xff]  ;;  %v73_v14 = vld [vmem:[%s2433_s0 + $0x1a8] sm:$0xff]  ;;  %v74_v15 = vld [vmem:[%s2433_s0 + $0x1b0] sm:$0xff] }
  0x19   :  { %1447 = vmatprep.mubr.msk.f32.mxu0 %vm92_vm1, %v32_v13  ;;  %v72_v13 = vld [vmem:[%s2433_s0 + $0x1a0] sm:$0xff]  ;;  %v77_v18 = vld [vmem:[%s2433_s0 + $0x1c8] sm:$0xff]  ;;  %v78_v19 = vld [vmem:[%s2433_s0 + $0x1d0] sm:$0xff] }
  0x1a   :  { %1672 = vmatpush3.bf16.msra.mxu0 %v1669_v34  ;;  %v76_v17 = vld [vmem:[%s2433_s0 + $0x1c0] sm:$0xff]  ;;  %v81_v22 = vld [vmem:[%s2433_s0 + $0x1e8] sm:$0xff]  ;;  %v83_v24 = vld [vmem:[%s2433_s0 + $0x1f8] sm:$0xff] }
  0x1b   :  { %1697 = vmatpush3.bf16.msra.mxu1 %v1669_v34  ;;  %1674 = vmatprep.subr.bf16.mxu0 %v1673_v39  ;;  %v80_v21 = vld [vmem:[%s2433_s0 + $0x1e0] sm:$0xff] }
  0x1c   :  { %1448 = vmatmul.mubr.msk.f32.gmra.mrb[12].mxu0 %vm92_vm1, %v33_v20  ;;  %1690 = vmatprep.subr.bf16.mxu1 %v1673_v39  ;;  %v79_v20 = vld [vmem:[%s2433_s0 + $0x1d8] sm:$0xff] }
  0x1d   :  { %1450 = vmatprep.mubr.msk.f32.mxu0 %vm92_vm1, %v34_v23  ;;  %v82_v23 = vld [vmem:[%s2433_s0 + $0x1f0] sm:$0xff] }
  0x1e   :  { %1676 = vmatpush3.bf16.msra.mxu0 %v1673_v39 }
  0x1f   :  { %1698 = vmatpush3.bf16.msra.mxu1 %v1673_v39  ;;  %1678 = vmatprep.subr.bf16.mxu0 %v1677_v44 }
  0x20   :  { %1451 = vmatmul.mubr.msk.f32.gmra.mrb[14].mxu0 %vm92_vm1, %v35_v25  ;;  %1691 = vmatprep.subr.bf16.mxu1 %v1677_v44  ;;  %v2041_v25 = vld [vmem:[%s2435_s2] ss:$0 sm:$0xff] }
  0x21   :  { %1453 = vmatprep.mubr.msk.f32.mxu0 %vm92_vm1, %v36_v28 }
  0x22   :  { %1680 = vmatpush3.bf16.msra.mxu0 %v1677_v44 }
  0x23   :  { %1699 = vmatpush3.bf16.msra.mxu1 %v1677_v44  ;;  %1682 = vmatprep.subr.bf16.mxu0 %v1681_v5 }
  0x24   :  { %1454 = vmatmul.mubr.msk.f32.gmra.mrb[16].mxu0 %vm92_vm1, %v37_v30  ;;  %1692 = vmatprep.subr.bf16.mxu1 %v1681_v5 }
  0x25   :  { %1456 = vmatprep.mubr.msk.f32.mxu0 %vm92_vm1, %v38_v33 }
  0x26   :  { %1684 = vmatpush3.bf16.msra.mxu0 %v1681_v5 }
  0x27   :  { %1700 = vmatpush3.bf16.msra.mxu1 %v1681_v5 }
  0x28   :  { %1457 = vmatmul.mubr.msk.f32.gmra.mrb[18].mxu0 %vm92_vm1, %v39_v35 }
  0x29   :  { %1459 = vmatprep.mubr.msk.f32.mxu0 %vm92_vm1, %v40_v38 }
  0x2c   :  { %1460 = vmatmul.mubr.msk.f32.gmra.mrb[20].mxu0 %vm92_vm1, %v41_v40 }
  0x2d   :  { %1462 = vmatprep.mubr.msk.f32.mxu0 %vm92_vm1, %v42_v43 }
  0x30   :  { %1463 = vmatmul.mubr.msk.f32.gmra.mrb[22].mxu0 %vm92_vm1, %v43_v45 }
  0x31   :  { %1465 = vmatprep.mubr.msk.f32.mxu0 %vm92_vm1, %v44_v46 }
  0x34   :  { %1466 = vmatmul.mubr.msk.f32.gmra.mrb[24].mxu0 %vm92_vm1, %v45_v47 }
  0x35   :  { %1468 = vmatprep.mubr.msk.f32.mxu0 %vm92_vm1, %v46_v48 }
  0x38   :  { %1469 = vmatmul.mubr.msk.f32.gmra.mrb[26].mxu0 %vm92_vm1, %v47_v49 }
  0x39   :  { %1471 = vmatprep.mubr.msk.f32.mxu0 %vm92_vm1, %v48_v50 }
  0x3c   :  { %1472 = vmatmul.mubr.msk.f32.gmra.mrb[28].mxu0 %vm92_vm1, %v49_v51 }
  0x3d   :  { %1474 = vmatprep.mubr.msk.f32.mxu0 %vm92_vm1, %v50_v52 }
  0x40   :  { %1475 = vmatmul.mubr.msk.f32.gmra.mrb[30].mxu0 %vm92_vm1, %v51_v53 }
  0x41   :  { %1477 = vmatprep.mubr.msk.f32.mxu0 %vm92_vm1, %v52_v54 }
  0x44   :  { %1478 = vmatmul.mubr.msk.f32.gmra.mrb[32].mxu0 %vm92_vm1, %v53_v55 }
  0x45   :  { %1480 = vmatprep.mubr.msk.f32.mxu0 %vm92_vm1, %v54_v56 }
  0x48   :  { %1481 = vmatmul.mubr.msk.f32.gmra.mrb[34].mxu0 %vm92_vm1, %v55_v57 }
  0x49   :  { %1483 = vmatprep.mubr.msk.f32.mxu0 %vm92_vm1, %v56_v58 }
  0x4c   :  { %1484 = vmatmul.mubr.msk.f32.gmra.mrb[36].mxu0 %vm92_vm1, %v57_v59 }
  0x4d   :  { %1486 = vmatprep.mubr.msk.f32.mxu0 %vm92_vm1, %v58_v60 }
  0x50   :  { %1487 = vmatmul.mubr.msk.f32.gmra.mrb[38].mxu0 %vm92_vm1, %v59_v61 }
  0x51   :  { %1489 = vmatprep.mubr.msk.f32.mxu0 %vm92_vm1, %v60_v62 }
  0x54   :  { %1490 = vmatmul.mubr.msk.f32.gmra.mrb[40].mxu0 %vm92_vm1, %v61_v63 }
  0x55   :  { %1492 = vmatprep.mubr.msk.f32.mxu0 %vm92_vm1, %v62_v0 }
  0x58   :  { %1493 = vmatmul.mubr.msk.f32.gmra.mrb[42].mxu0 %vm92_vm1, %v63_v1 }
  0x59   :  { %1495 = vmatprep.mubr.msk.f32.mxu0 %vm92_vm1, %v64_v2 }
  0x5c   :  { %1496 = vmatmul.mubr.msk.f32.gmra.mrb[44].mxu0 %vm92_vm1, %v65_v6 }
  0x5d   :  { %1498 = vmatprep.mubr.msk.f32.mxu0 %vm92_vm1, %v66_v7 }
  0x60   :  { %1499 = vmatmul.mubr.msk.f32.gmra.mrb[46].mxu0 %vm92_vm1, %v67_v8 }
  0x61   :  { %1501 = vmatprep.mubr.msk.f32.mxu0 %vm92_vm1, %v68_v9 }
  0x64   :  { %1502 = vmatmul.mubr.msk.f32.gmra.mrb[48].mxu0 %vm92_vm1, %v69_v10 }
  0x65   :  { %1504 = vmatprep.mubr.msk.f32.mxu0 %vm92_vm1, %v70_v11 }
  0x68   :  { %1505 = vmatmul.mubr.msk.f32.gmra.mrb[50].mxu0 %vm92_vm1, %v71_v12 }
  0x69   :  { %1507 = vmatprep.mubr.msk.f32.mxu0 %vm92_vm1, %v72_v13 }
  0x6c   :  { %1508 = vmatmul.mubr.msk.f32.gmra.mrb[52].mxu0 %vm92_vm1, %v73_v14 }
  0x6d   :  { %1510 = vmatprep.mubr.msk.f32.mxu0 %vm92_vm1, %v74_v15 }
  0x70   :  { %1511 = vmatmul.mubr.msk.f32.gmra.mrb[54].mxu0 %vm92_vm1, %v75_v16 }
  0x71   :  { %1513 = vmatprep.mubr.msk.f32.mxu0 %vm92_vm1, %v76_v17 }
  0x74   :  { %1514 = vmatmul.mubr.msk.f32.gmra.mrb[56].mxu0 %vm92_vm1, %v77_v18 }
  0x75   :  { %1516 = vmatprep.mubr.msk.f32.mxu0 %vm92_vm1, %v78_v19 }
  0x78   :  { %1517 = vmatmul.mubr.msk.f32.gmra.mrb[58].mxu0 %vm92_vm1, %v79_v20 }
  0x79   :  { %1519 = vmatprep.mubr.msk.f32.mxu0 %vm92_vm1, %v80_v21 }
  0x7c   :  { %1520 = vmatmul.mubr.msk.f32.gmra.mrb[60].mxu0 %vm92_vm1, %v81_v22 }
  0x7d   :  { %1522 = vmatprep.mubr.msk.f32.mxu0 %vm92_vm1, %v82_v23 }
  0x80   :  { %1523 = vmatmul.mubr.msk.f32.gmra.mrb[62].mxu0 %vm92_vm1, %v83_v24 }
  0xd7   :  { %v1431_v26 = vpop.f32.mrb[0].mxu0 }
  0xd8   :  { %v361_v27 = vadd.f32 %v1431_v26, %v2041_v25  ;;  %v355_v28 = vpop.f32.mrb[1].mxu0 }
  0xd9   :  { %v356_v29 = vadd.f32 %v2041_v25, %v355_v28 }
  0xda   :  { %v675_v32 = vmax.f32 %v361_v27, 0.0 }
  0xdb   :  { %v674_v30 = vmax.f32 %v356_v29, 0.0  ;;  %v1434_v31 = vpop.f32.mrb[2].mxu0 }
  0xdc   :  { %v371_v33 = vadd.f32 %v1434_v31, %v2041_v25  ;;  %v365_v34 = vpop.f32.mrb[3].mxu0 }
  0xdd   :  { %v366_v35 = vadd.f32 %v2041_v25, %v365_v34  ;;  %1557 = vmatprep.mubr.f32.mxu0 %v674_v30 }
  0xde   :  { %1558 = vmatmul.mubr.f32.vlgmr.msra.gmra.mrb[64].mxu0 %v675_v32  ;;  %v677_v38 = vmax.f32 %v371_v33, 0.0 }
  0xdf   :  { %v676_v36 = vmax.f32 %v366_v35, 0.0  ;;  %v1437_v37 = vpop.f32.mrb[4].mxu0 }
  0xe0   :  { %v381_v39 = vadd.f32 %v1437_v37, %v2041_v25  ;;  %v375_v40 = vpop.f32.mrb[5].mxu0 }
  0xe1   :  { %v376_v41 = vadd.f32 %v2041_v25, %v375_v40  ;;  %1560 = vmatprep.mubr.f32.mxu0 %v676_v36 }
  0xe2   :  { %1561 = vmatmul.mubr.f32.gmra.mrb[66].mxu0 %v677_v38  ;;  %v679_v44 = vmax.f32 %v381_v39, 0.0 }
  0xe3   :  { %v678_v42 = vmax.f32 %v376_v41, 0.0  ;;  %v1440_v43 = vpop.f32.mrb[6].mxu0 }
  0xe4   :  { %v391_v45 = vadd.f32 %v1440_v43, %v2041_v25  ;;  %v385_v46 = vpop.f32.mrb[7].mxu0 }
  0xe5   :  { %1563 = vmatprep.mubr.f32.mxu0 %v678_v42  ;;  %v386_v47 = vadd.f32 %v2041_v25, %v385_v46 }
  0xe6   :  { %1564 = vmatmul.mubr.f32.gmra.mrb[68].mxu0 %v679_v44  ;;  %v681_v50 = vmax.f32 %v391_v45, 0.0 }
  0xe7   :  { %v1443_v48 = vpop.f32.mrb[8].mxu0  ;;  %v680_v49 = vmax.f32 %v386_v47, 0.0 }
  0xe8   :  { %v401_v51 = vadd.f32 %v1443_v48, %v2041_v25  ;;  %v395_v52 = vpop.f32.mrb[9].mxu0 }
  0xe9   :  { %v396_v53 = vadd.f32 %v2041_v25, %v395_v52  ;;  %1566 = vmatprep.mubr.f32.mxu1 %v680_v49 }
  0xea   :  { %1567 = vmatmul.mubr.f32.vlgmr.msra.gmra.mrb[0].mxu1 %v681_v50  ;;  %v683_v56 = vmax.f32 %v401_v51, 0.0 }
  0xeb   :  { %v682_v54 = vmax.f32 %v396_v53, 0.0  ;;  %v1446_v55 = vpop.f32.mrb[10].mxu0 }
  0xec   :  { %v411_v57 = vadd.f32 %v1446_v55, %v2041_v25  ;;  %v405_v58 = vpop.f32.mrb[11].mxu0 }
  0xed   :  { %v406_v59 = vadd.f32 %v2041_v25, %v405_v58  ;;  %1569 = vmatprep.mubr.f32.mxu1 %v682_v54 }
  0xee   :  { %1570 = vmatmul.mubr.f32.gmra.mrb[2].mxu1 %v683_v56  ;;  %v685_v62 = vmax.f32 %v411_v57, 0.0 }
  0xef   :  { %v684_v60 = vmax.f32 %v406_v59, 0.0  ;;  %v1449_v61 = vpop.f32.mrb[12].mxu0 }
  0xf0   :  { %v421_v63 = vadd.f32 %v1449_v61, %v2041_v25  ;;  %v415_v0 = vpop.f32.mrb[13].mxu0 }
  0xf1   :  { %v416_v1 = vadd.f32 %v2041_v25, %v415_v0  ;;  %1572 = vmatprep.mubr.f32.mxu1 %v684_v60 }
  0xf2   :  { %1573 = vmatmul.mubr.f32.gmra.mrb[4].mxu1 %v685_v62  ;;  %v687_v4 = vmax.f32 %v421_v63, 0.0 }
  0xf3   :  { %v686_v2 = vmax.f32 %v416_v1, 0.0  ;;  %v1452_v3 = vpop.f32.mrb[14].mxu0 }
  0xf4   :  { %v431_v5 = vadd.f32 %v1452_v3, %v2041_v25  ;;  %v425_v6 = vpop.f32.mrb[15].mxu0 }
  0xf5   :  { %v426_v7 = vadd.f32 %v2041_v25, %v425_v6  ;;  %1575 = vmatprep.mubr.f32.mxu1 %v686_v2 }
  0xf6   :  { %1576 = vmatmul.mubr.f32.gmra.mrb[6].mxu1 %v687_v4  ;;  %v689_v10 = vmax.f32 %v431_v5, 0.0 }
  0xf7   :  { %v688_v8 = vmax.f32 %v426_v7, 0.0  ;;  %v1455_v9 = vpop.f32.mrb[16].mxu0 }
  0xf8   :  { %v441_v11 = vadd.f32 %v1455_v9, %v2041_v25  ;;  %v435_v12 = vpop.f32.mrb[17].mxu0 }
  0xf9   :  { %v436_v13 = vadd.f32 %v2041_v25, %v435_v12  ;;  %1578 = vmatprep.mubr.f32.mxu1 %v688_v8 }
  0xfa   :  { %1579 = vmatmul.mubr.f32.gmra.mrb[8].mxu1 %v689_v10  ;;  %v691_v16 = vmax.f32 %v441_v11, 0.0 }
  0xfb   :  { %v690_v14 = vmax.f32 %v436_v13, 0.0  ;;  %v1458_v15 = vpop.f32.mrb[18].mxu0 }
  0xfc   :  { %v451_v17 = vadd.f32 %v1458_v15, %v2041_v25  ;;  %v445_v18 = vpop.f32.mrb[19].mxu0 }
  0xfd   :  { %v446_v19 = vadd.f32 %v2041_v25, %v445_v18  ;;  %1581 = vmatprep.mubr.f32.mxu1 %v690_v14 }
  0xfe   :  { %1582 = vmatmul.mubr.f32.gmra.mrb[10].mxu1 %v691_v16  ;;  %v693_v22 = vmax.f32 %v451_v17, 0.0 }
  0xff   :  { %v692_v20 = vmax.f32 %v446_v19, 0.0  ;;  %v1461_v21 = vpop.f32.mrb[20].mxu0 }
 0x100   :  { %v461_v23 = vadd.f32 %v1461_v21, %v2041_v25  ;;  %v455_v24 = vpop.f32.mrb[21].mxu0 }
 0x101   :  { %v456_v26 = vadd.f32 %v2041_v25, %v455_v24  ;;  %1584 = vmatprep.mubr.f32.mxu1 %v692_v20 }
 0x102   :  { %1585 = vmatmul.mubr.f32.gmra.mrb[12].mxu1 %v693_v22  ;;  %v695_v29 = vmax.f32 %v461_v23, 0.0 }
 0x103   :  { %v694_v27 = vmax.f32 %v456_v26, 0.0  ;;  %v1464_v28 = vpop.f32.mrb[22].mxu0 }
 0x104   :  { %v471_v30 = vadd.f32 %v1464_v28, %v2041_v25  ;;  %v465_v31 = vpop.f32.mrb[23].mxu0 }
 0x105   :  { %v466_v32 = vadd.f32 %v2041_v25, %v465_v31  ;;  %1587 = vmatprep.mubr.f32.mxu1 %v694_v27 }
 0x106   :  { %1588 = vmatmul.mubr.f32.gmra.mrb[14].mxu1 %v695_v29  ;;  %v697_v35 = vmax.f32 %v471_v30, 0.0 }
 0x107   :  { %v696_v33 = vmax.f32 %v466_v32, 0.0  ;;  %v1467_v34 = vpop.f32.mrb[24].mxu0 }
 0x108   :  { %v481_v36 = vadd.f32 %v1467_v34, %v2041_v25  ;;  %v475_v37 = vpop.f32.mrb[25].mxu0 }
 0x109   :  { %v476_v38 = vadd.f32 %v2041_v25, %v475_v37  ;;  %1590 = vmatprep.mubr.f32.mxu1 %v696_v33 }
 0x10a   :  { %1591 = vmatmul.mubr.f32.gmra.mrb[16].mxu1 %v697_v35  ;;  %v699_v41 = vmax.f32 %v481_v36, 0.0 }
 0x10b   :  { %v698_v39 = vmax.f32 %v476_v38, 0.0  ;;  %v1470_v40 = vpop.f32.mrb[26].mxu0 }
 0x10c   :  { %v491_v42 = vadd.f32 %v1470_v40, %v2041_v25  ;;  %v485_v43 = vpop.f32.mrb[27].mxu0 }
 0x10d   :  { %v486_v44 = vadd.f32 %v2041_v25, %v485_v43  ;;  %1593 = vmatprep.mubr.f32.mxu1 %v698_v39 }
 0x10e   :  { %1594 = vmatmul.mubr.f32.gmra.mrb[18].mxu1 %v699_v41  ;;  %v701_v47 = vmax.f32 %v491_v42, 0.0 }
 0x10f   :  { %v700_v45 = vmax.f32 %v486_v44, 0.0  ;;  %v1473_v46 = vpop.f32.mrb[28].mxu0 }
 0x110   :  { %v501_v48 = vadd.f32 %v1473_v46, %v2041_v25  ;;  %v495_v49 = vpop.f32.mrb[29].mxu0 }
 0x111   :  { %v496_v50 = vadd.f32 %v2041_v25, %v495_v49  ;;  %1596 = vmatprep.mubr.f32.mxu1 %v700_v45 }
 0x112   :  { %1597 = vmatmul.mubr.f32.gmra.mrb[20].mxu1 %v701_v47  ;;  %v703_v53 = vmax.f32 %v501_v48, 0.0 }
 0x113   :  { %v702_v51 = vmax.f32 %v496_v50, 0.0  ;;  %v1476_v52 = vpop.f32.mrb[30].mxu0 }
 0x114   :  { %v511_v54 = vadd.f32 %v1476_v52, %v2041_v25  ;;  %v505_v55 = vpop.f32.mrb[31].mxu0 }
 0x115   :  { %v506_v56 = vadd.f32 %v2041_v25, %v505_v55  ;;  %1599 = vmatprep.mubr.f32.mxu1 %v702_v51 }
 0x116   :  { %1600 = vmatmul.mubr.f32.gmra.mrb[22].mxu1 %v703_v53  ;;  %v705_v59 = vmax.f32 %v511_v54, 0.0 }
 0x117   :  { %v704_v57 = vmax.f32 %v506_v56, 0.0  ;;  %v1479_v58 = vpop.f32.mrb[32].mxu0 }
 0x118   :  { %v521_v60 = vadd.f32 %v1479_v58, %v2041_v25  ;;  %v515_v61 = vpop.f32.mrb[33].mxu0 }
 0x119   :  { %v516_v62 = vadd.f32 %v2041_v25, %v515_v61  ;;  %1602 = vmatprep.mubr.f32.mxu1 %v704_v57 }
 0x11a   :  { %1603 = vmatmul.mubr.f32.gmra.mrb[24].mxu1 %v705_v59  ;;  %v707_v1 = vmax.f32 %v521_v60, 0.0 }
 0x11b   :  { %v706_v63 = vmax.f32 %v516_v62, 0.0  ;;  %v1482_v0 = vpop.f32.mrb[34].mxu0 }
 0x11c   :  { %v531_v2 = vadd.f32 %v1482_v0, %v2041_v25  ;;  %v525_v3 = vpop.f32.mrb[35].mxu0 }
 0x11d   :  { %v526_v4 = vadd.f32 %v2041_v25, %v525_v3  ;;  %1605 = vmatprep.mubr.f32.mxu1 %v706_v63 }
 0x11e   :  { %1606 = vmatmul.mubr.f32.gmra.mrb[26].mxu1 %v707_v1  ;;  %v709_v7 = vmax.f32 %v531_v2, 0.0 }
 0x11f   :  { %v708_v5 = vmax.f32 %v526_v4, 0.0  ;;  %v1485_v6 = vpop.f32.mrb[36].mxu0 }
 0x120   :  { %v541_v8 = vadd.f32 %v1485_v6, %v2041_v25  ;;  %v535_v9 = vpop.f32.mrb[37].mxu0 }
 0x121   :  { %v536_v10 = vadd.f32 %v2041_v25, %v535_v9  ;;  %1608 = vmatprep.mubr.f32.mxu1 %v708_v5 }
 0x122   :  { %1609 = vmatmul.mubr.f32.gmra.mrb[28].mxu1 %v709_v7  ;;  %v711_v13 = vmax.f32 %v541_v8, 0.0 }
 0x123   :  { %v710_v11 = vmax.f32 %v536_v10, 0.0  ;;  %v1488_v12 = vpop.f32.mrb[38].mxu0 }
 0x124   :  { %v551_v14 = vadd.f32 %v1488_v12, %v2041_v25  ;;  %v545_v15 = vpop.f32.mrb[39].mxu0 }
 0x125   :  { %v546_v16 = vadd.f32 %v2041_v25, %v545_v15  ;;  %1611 = vmatprep.mubr.f32.mxu1 %v710_v11 }
 0x126   :  { %1612 = vmatmul.mubr.f32.gmra.mrb[30].mxu1 %v711_v13  ;;  %v713_v19 = vmax.f32 %v551_v14, 0.0 }
 0x127   :  { %v712_v17 = vmax.f32 %v546_v16, 0.0  ;;  %v1491_v18 = vpop.f32.mrb[40].mxu0 }
 0x128   :  { %v561_v20 = vadd.f32 %v1491_v18, %v2041_v25  ;;  %v555_v21 = vpop.f32.mrb[41].mxu0 }
 0x129   :  { %v556_v22 = vadd.f32 %v2041_v25, %v555_v21  ;;  %1614 = vmatprep.mubr.f32.mxu1 %v712_v17 }
 0x12a   :  { %1615 = vmatmul.mubr.f32.gmra.mrb[32].mxu1 %v713_v19  ;;  %v715_v26 = vmax.f32 %v561_v20, 0.0 }
 0x12b   :  { %v714_v23 = vmax.f32 %v556_v22, 0.0  ;;  %v1494_v24 = vpop.f32.mrb[42].mxu0 }
 0x12c   :  { %v571_v27 = vadd.f32 %v1494_v24, %v2041_v25  ;;  %v565_v28 = vpop.f32.mrb[43].mxu0 }
 0x12d   :  { %v566_v29 = vadd.f32 %v2041_v25, %v565_v28  ;;  %1617 = vmatprep.mubr.f32.mxu1 %v714_v23 }
 0x12e   :  { %1618 = vmatmul.mubr.f32.gmra.mrb[34].mxu1 %v715_v26  ;;  %v717_v32 = vmax.f32 %v571_v27, 0.0 }
 0x12f   :  { %v716_v30 = vmax.f32 %v566_v29, 0.0  ;;  %v1497_v31 = vpop.f32.mrb[44].mxu0  ;;  %v2110_v29 = vld [vmem:[%s2436_s4] ss:$0 sm:$0xff] }
 0x130   :  { %v581_v33 = vadd.f32 %v1497_v31, %v2041_v25  ;;  %v575_v34 = vpop.f32.mrb[45].mxu0 }
 0x131   :  { %v576_v35 = vadd.f32 %v2041_v25, %v575_v34  ;;  %1620 = vmatprep.mubr.f32.mxu1 %v716_v30 }
 0x132   :  { %1621 = vmatmul.mubr.f32.gmra.mrb[36].mxu1 %v717_v32  ;;  %v719_v38 = vmax.f32 %v581_v33, 0.0 }
 0x133   :  { %v718_v36 = vmax.f32 %v576_v35, 0.0  ;;  %v1500_v37 = vpop.f32.mrb[46].mxu0 }
 0x134   :  { %v591_v39 = vadd.f32 %v1500_v37, %v2041_v25  ;;  %v585_v40 = vpop.f32.mrb[47].mxu0 }
 0x135   :  { %v586_v41 = vadd.f32 %v2041_v25, %v585_v40  ;;  %1623 = vmatprep.mubr.f32.mxu1 %v718_v36 }
 0x136   :  { %1624 = vmatmul.mubr.f32.gmra.mrb[38].mxu1 %v719_v38  ;;  %v721_v44 = vmax.f32 %v591_v39, 0.0 }
 0x137   :  { %v720_v42 = vmax.f32 %v586_v41, 0.0  ;;  %v1503_v43 = vpop.f32.mrb[48].mxu0 }
 0x138   :  { %v601_v45 = vadd.f32 %v1503_v43, %v2041_v25  ;;  %v595_v46 = vpop.f32.mrb[49].mxu0 }
 0x139   :  { %v596_v47 = vadd.f32 %v2041_v25, %v595_v46  ;;  %1626 = vmatprep.mubr.f32.mxu1 %v720_v42 }
 0x13a   :  { %1627 = vmatmul.mubr.f32.gmra.mrb[40].mxu1 %v721_v44  ;;  %v723_v50 = vmax.f32 %v601_v45, 0.0 }
 0x13b   :  { %v722_v48 = vmax.f32 %v596_v47, 0.0  ;;  %v1506_v49 = vpop.f32.mrb[50].mxu0 }
 0x13c   :  { %v611_v51 = vadd.f32 %v1506_v49, %v2041_v25  ;;  %v605_v52 = vpop.f32.mrb[51].mxu0 }
 0x13d   :  { %v606_v53 = vadd.f32 %v2041_v25, %v605_v52  ;;  %1629 = vmatprep.mubr.f32.mxu1 %v722_v48 }
 0x13e   :  { %1630 = vmatmul.mubr.f32.gmra.mrb[42].mxu1 %v723_v50  ;;  %v725_v56 = vmax.f32 %v611_v51, 0.0 }
 0x13f   :  { %v724_v54 = vmax.f32 %v606_v53, 0.0  ;;  %v1509_v55 = vpop.f32.mrb[52].mxu0 }
 0x140   :  { %v621_v57 = vadd.f32 %v1509_v55, %v2041_v25  ;;  %v615_v58 = vpop.f32.mrb[53].mxu0 }
 0x141   :  { %v616_v59 = vadd.f32 %v2041_v25, %v615_v58  ;;  %1632 = vmatprep.mubr.f32.mxu1 %v724_v54 }
 0x142   :  { %1633 = vmatmul.mubr.f32.gmra.mrb[44].mxu1 %v725_v56  ;;  %v727_v62 = vmax.f32 %v621_v57, 0.0 }
 0x143   :  { %v726_v60 = vmax.f32 %v616_v59, 0.0  ;;  %v1512_v61 = vpop.f32.mrb[54].mxu0 }
 0x144   :  { %v631_v63 = vadd.f32 %v1512_v61, %v2041_v25  ;;  %v625_v0 = vpop.f32.mrb[55].mxu0 }
 0x145   :  { %v626_v1 = vadd.f32 %v2041_v25, %v625_v0  ;;  %1635 = vmatprep.mubr.f32.mxu1 %v726_v60 }
 0x146   :  { %1636 = vmatmul.mubr.f32.gmra.mrb[46].mxu1 %v727_v62  ;;  %v729_v4 = vmax.f32 %v631_v63, 0.0 }
 0x147   :  { %v728_v2 = vmax.f32 %v626_v1, 0.0  ;;  %v1515_v3 = vpop.f32.mrb[56].mxu0 }
 0x148   :  { %v641_v5 = vadd.f32 %v1515_v3, %v2041_v25  ;;  %v635_v6 = vpop.f32.mrb[57].mxu0 }
 0x149   :  { %v636_v7 = vadd.f32 %v2041_v25, %v635_v6  ;;  %1638 = vmatprep.mubr.f32.mxu1 %v728_v2 }
 0x14a   :  { %1639 = vmatmul.mubr.f32.gmra.mrb[48].mxu1 %v729_v4  ;;  %v731_v10 = vmax.f32 %v641_v5, 0.0 }
 0x14b   :  { %v730_v8 = vmax.f32 %v636_v7, 0.0  ;;  %v1518_v9 = vpop.f32.mrb[58].mxu0 }
 0x14c   :  { %v651_v11 = vadd.f32 %v1518_v9, %v2041_v25  ;;  %v645_v12 = vpop.f32.mrb[59].mxu0 }
 0x14d   :  { %v646_v13 = vadd.f32 %v2041_v25, %v645_v12  ;;  %1641 = vmatprep.mubr.f32.mxu1 %v730_v8 }
 0x14e   :  { %1642 = vmatmul.mubr.f32.gmra.mrb[50].mxu1 %v731_v10  ;;  %v733_v16 = vmax.f32 %v651_v11, 0.0 }
 0x14f   :  { %v732_v14 = vmax.f32 %v646_v13, 0.0  ;;  %v1521_v15 = vpop.f32.mrb[60].mxu0 }
 0x150   :  { %v661_v17 = vadd.f32 %v1521_v15, %v2041_v25  ;;  %v655_v18 = vpop.f32.mrb[61].mxu0 }
 0x151   :  { %v656_v19 = vadd.f32 %v2041_v25, %v655_v18  ;;  %1644 = vmatprep.mubr.f32.mxu1 %v732_v14 }
 0x152   :  { %1645 = vmatmul.mubr.f32.gmra.mrb[52].mxu1 %v733_v16  ;;  %v735_v22 = vmax.f32 %v661_v17, 0.0 }
 0x153   :  { %v734_v20 = vmax.f32 %v656_v19, 0.0  ;;  %v1524_v21 = vpop.f32.mrb[62].mxu0 }
 0x154   :  { %v671_v23 = vadd.f32 %v1524_v21, %v2041_v25  ;;  %v665_v24 = vpop.f32.mrb[63].mxu0 }
 0x155   :  { %v666_v26 = vadd.f32 %v2041_v25, %v665_v24  ;;  %1647 = vmatprep.mubr.f32.mxu1 %v734_v20 }
 0x156   :  { %1648 = vmatmul.mubr.f32.gmra.mrb[54].mxu1 %v735_v22  ;;  %v737_v28 = vmax.f32 %v671_v23, 0.0 }
 0x157   :  { %v736_v27 = vmax.f32 %v666_v26, 0.0 }
 0x159   :  { %1650 = vmatprep.mubr.f32.mxu1 %v736_v27 }
 0x15a   :  { %1651 = vmatmul.mubr.f32.gmra.mrb[56].mxu1 %v737_v28 }
 0x1b1   :  { %v1559_v30 = vpop.f32.mrb[64].mxu0 }
 0x1b2   :  { %v833_v31 = vadd.f32 %v1559_v30, %v2110_v29  ;;  %v827_v32 = vpop.f32.mrb[65].mxu0 }
 0x1b3   :  { %v828_v33 = vadd.f32 %v2110_v29, %v827_v32 }
 0x1b4   :  { %1148 = vst.msk [vmem:[%s2437_s5 + $0x8] sm:$0xff] %vm1146_vm2, %v833_v31 }
 0x1b5   :  { %1147 = vst.msk [vmem:[%s2437_s5] sm:$0xff] %vm1146_vm2, %v828_v33  ;;  %v1562_v25 = vpop.f32.mrb[66].mxu0 }
 0x1b6   :  { %v843_v34 = vadd.f32 %v1562_v25, %v2110_v29  ;;  %v837_v35 = vpop.f32.mrb[67].mxu0 }
 0x1b7   :  { %v838_v36 = vadd.f32 %v2110_v29, %v837_v35 }
 0x1b8   :  { %1150 = vst.msk [vmem:[%s2437_s5 + $0x18] sm:$0xff] %vm1146_vm2, %v843_v34 }
 0x1b9   :  { %1149 = vst.msk [vmem:[%s2437_s5 + $0x10] sm:$0xff] %vm1146_vm2, %v838_v36  ;;  %v1565_v37 = vpop.f32.mrb[68].mxu0 }
 0x1ba   :  { %v853_v38 = vadd.f32 %v1565_v37, %v2110_v29  ;;  %v847_v39 = vpop.f32.mrb[69].mxu0 }
 0x1bb   :  { %v848_v40 = vadd.f32 %v2110_v29, %v847_v39 }
 0x1bc   :  { %1152 = vst.msk [vmem:[%s2437_s5 + $0x28] sm:$0xff] %vm1146_vm2, %v853_v38 }
 0x1bd   :  { %1151 = vst.msk [vmem:[%s2437_s5 + $0x20] sm:$0xff] %vm1146_vm2, %v848_v40  ;;  %v1568_v41 = vpop.f32.mrb[0].mxu1 }
 0x1be   :  { %v863_v42 = vadd.f32 %v1568_v41, %v2110_v29  ;;  %v857_v43 = vpop.f32.mrb[1].mxu1 }
 0x1bf   :  { %v858_v44 = vadd.f32 %v2110_v29, %v857_v43 }
 0x1c0   :  { %1154 = vst.msk [vmem:[%s2437_s5 + $0x38] sm:$0xff] %vm1146_vm2, %v863_v42 }
 0x1c1   :  { %1153 = vst.msk [vmem:[%s2437_s5 + $0x30] sm:$0xff] %vm1146_vm2, %v858_v44  ;;  %v1571_v45 = vpop.f32.mrb[2].mxu1 }
 0x1c2   :  { %v873_v46 = vadd.f32 %v1571_v45, %v2110_v29  ;;  %v867_v47 = vpop.f32.mrb[3].mxu1 }
 0x1c3   :  { %v868_v48 = vadd.f32 %v2110_v29, %v867_v47 }
 0x1c4   :  { %1156 = vst.msk [vmem:[%s2437_s5 + $0x48] sm:$0xff] %vm1146_vm2, %v873_v46 }
 0x1c5   :  { %1155 = vst.msk [vmem:[%s2437_s5 + $0x40] sm:$0xff] %vm1146_vm2, %v868_v48  ;;  %v1574_v49 = vpop.f32.mrb[4].mxu1 }
 0x1c6   :  { %v883_v50 = vadd.f32 %v1574_v49, %v2110_v29  ;;  %v877_v51 = vpop.f32.mrb[5].mxu1 }
 0x1c7   :  { %v878_v52 = vadd.f32 %v2110_v29, %v877_v51 }
 0x1c8   :  { %1158 = vst.msk [vmem:[%s2437_s5 + $0x58] sm:$0xff] %vm1146_vm2, %v883_v50 }
 0x1c9   :  { %1157 = vst.msk [vmem:[%s2437_s5 + $0x50] sm:$0xff] %vm1146_vm2, %v878_v52  ;;  %v1577_v53 = vpop.f32.mrb[6].mxu1 }
 0x1ca   :  { %v893_v54 = vadd.f32 %v1577_v53, %v2110_v29  ;;  %v887_v55 = vpop.f32.mrb[7].mxu1 }
 0x1cb   :  { %v888_v56 = vadd.f32 %v2110_v29, %v887_v55 }
 0x1cc   :  { %1160 = vst.msk [vmem:[%s2437_s5 + $0x68] sm:$0xff] %vm1146_vm2, %v893_v54 }
 0x1cd   :  { %1159 = vst.msk [vmem:[%s2437_s5 + $0x60] sm:$0xff] %vm1146_vm2, %v888_v56  ;;  %v1580_v57 = vpop.f32.mrb[8].mxu1 }
 0x1ce   :  { %v903_v58 = vadd.f32 %v1580_v57, %v2110_v29  ;;  %v897_v59 = vpop.f32.mrb[9].mxu1 }
 0x1cf   :  { %v898_v60 = vadd.f32 %v2110_v29, %v897_v59 }
 0x1d0   :  { %1162 = vst.msk [vmem:[%s2437_s5 + $0x78] sm:$0xff] %vm1146_vm2, %v903_v58 }
 0x1d1   :  { %1161 = vst.msk [vmem:[%s2437_s5 + $0x70] sm:$0xff] %vm1146_vm2, %v898_v60  ;;  %v1583_v61 = vpop.f32.mrb[10].mxu1 }
 0x1d2   :  { %v913_v62 = vadd.f32 %v1583_v61, %v2110_v29  ;;  %v907_v63 = vpop.f32.mrb[11].mxu1 }
 0x1d3   :  { %v908_v0 = vadd.f32 %v2110_v29, %v907_v63 }
 0x1d4   :  { %1164 = vst.msk [vmem:[%s2437_s5 + $0x88] sm:$0xff] %vm1146_vm2, %v913_v62 }
 0x1d5   :  { %1163 = vst.msk [vmem:[%s2437_s5 + $0x80] sm:$0xff] %vm1146_vm2, %v908_v0  ;;  %v1586_v1 = vpop.f32.mrb[12].mxu1 }
 0x1d6   :  { %v923_v2 = vadd.f32 %v1586_v1, %v2110_v29  ;;  %v917_v3 = vpop.f32.mrb[13].mxu1 }
 0x1d7   :  { %v918_v4 = vadd.f32 %v2110_v29, %v917_v3 }
 0x1d8   :  { %1166 = vst.msk [vmem:[%s2437_s5 + $0x98] sm:$0xff] %vm1146_vm2, %v923_v2 }
 0x1d9   :  { %1165 = vst.msk [vmem:[%s2437_s5 + $0x90] sm:$0xff] %vm1146_vm2, %v918_v4  ;;  %v1589_v5 = vpop.f32.mrb[14].mxu1 }
 0x1da   :  { %v933_v6 = vadd.f32 %v1589_v5, %v2110_v29  ;;  %v927_v7 = vpop.f32.mrb[15].mxu1 }
 0x1db   :  { %v928_v8 = vadd.f32 %v2110_v29, %v927_v7 }
 0x1dc   :  { %1168 = vst.msk [vmem:[%s2437_s5 + $0xa8] sm:$0xff] %vm1146_vm2, %v933_v6 }
 0x1dd   :  { %1167 = vst.msk [vmem:[%s2437_s5 + $0xa0] sm:$0xff] %vm1146_vm2, %v928_v8  ;;  %v1592_v9 = vpop.f32.mrb[16].mxu1 }
 0x1de   :  { %v943_v10 = vadd.f32 %v1592_v9, %v2110_v29  ;;  %v937_v11 = vpop.f32.mrb[17].mxu1 }
 0x1df   :  { %v938_v12 = vadd.f32 %v2110_v29, %v937_v11 }
 0x1e0   :  { %1170 = vst.msk [vmem:[%s2437_s5 + $0xb8] sm:$0xff] %vm1146_vm2, %v943_v10 }
 0x1e1   :  { %1169 = vst.msk [vmem:[%s2437_s5 + $0xb0] sm:$0xff] %vm1146_vm2, %v938_v12  ;;  %v1595_v13 = vpop.f32.mrb[18].mxu1 }
 0x1e2   :  { %v953_v14 = vadd.f32 %v1595_v13, %v2110_v29  ;;  %v947_v15 = vpop.f32.mrb[19].mxu1 }
 0x1e3   :  { %v948_v16 = vadd.f32 %v2110_v29, %v947_v15 }
 0x1e4   :  { %1172 = vst.msk [vmem:[%s2437_s5 + $0xc8] sm:$0xff] %vm1146_vm2, %v953_v14 }
 0x1e5   :  { %1171 = vst.msk [vmem:[%s2437_s5 + $0xc0] sm:$0xff] %vm1146_vm2, %v948_v16  ;;  %v1598_v17 = vpop.f32.mrb[20].mxu1 }
 0x1e6   :  { %v963_v18 = vadd.f32 %v1598_v17, %v2110_v29  ;;  %v957_v19 = vpop.f32.mrb[21].mxu1 }
 0x1e7   :  { %v958_v20 = vadd.f32 %v2110_v29, %v957_v19 }
 0x1e8   :  { %1174 = vst.msk [vmem:[%s2437_s5 + $0xd8] sm:$0xff] %vm1146_vm2, %v963_v18 }
 0x1e9   :  { %1173 = vst.msk [vmem:[%s2437_s5 + $0xd0] sm:$0xff] %vm1146_vm2, %v958_v20  ;;  %v1601_v21 = vpop.f32.mrb[22].mxu1 }
 0x1ea   :  { %v973_v22 = vadd.f32 %v1601_v21, %v2110_v29  ;;  %v967_v23 = vpop.f32.mrb[23].mxu1 }
 0x1eb   :  { %v968_v24 = vadd.f32 %v2110_v29, %v967_v23 }
 0x1ec   :  { %1176 = vst.msk [vmem:[%s2437_s5 + $0xe8] sm:$0xff] %vm1146_vm2, %v973_v22 }
 0x1ed   :  { %1175 = vst.msk [vmem:[%s2437_s5 + $0xe0] sm:$0xff] %vm1146_vm2, %v968_v24  ;;  %v1604_v26 = vpop.f32.mrb[24].mxu1 }
 0x1ee   :  { %v983_v27 = vadd.f32 %v1604_v26, %v2110_v29  ;;  %v977_v28 = vpop.f32.mrb[25].mxu1 }
 0x1ef   :  { %v978_v30 = vadd.f32 %v2110_v29, %v977_v28 }
 0x1f0   :  { %1178 = vst.msk [vmem:[%s2437_s5 + $0xf8] sm:$0xff] %vm1146_vm2, %v983_v27 }
 0x1f1   :  { %1177 = vst.msk [vmem:[%s2437_s5 + $0xf0] sm:$0xff] %vm1146_vm2, %v978_v30  ;;  %v1607_v31 = vpop.f32.mrb[26].mxu1 }
 0x1f2   :  { %v993_v32 = vadd.f32 %v1607_v31, %v2110_v29  ;;  %v987_v33 = vpop.f32.mrb[27].mxu1 }
 0x1f3   :  { %v988_v25 = vadd.f32 %v2110_v29, %v987_v33 }
 0x1f4   :  { %1180 = vst.msk [vmem:[%s2437_s5 + $0x108] sm:$0xff] %vm1146_vm2, %v993_v32 }
 0x1f5   :  { %1179 = vst.msk [vmem:[%s2437_s5 + $0x100] sm:$0xff] %vm1146_vm2, %v988_v25  ;;  %v1610_v34 = vpop.f32.mrb[28].mxu1 }
 0x1f6   :  { %v1003_v35 = vadd.f32 %v1610_v34, %v2110_v29  ;;  %v997_v36 = vpop.f32.mrb[29].mxu1 }
 0x1f7   :  { %v998_v37 = vadd.f32 %v2110_v29, %v997_v36 }
 0x1f8   :  { %1182 = vst.msk [vmem:[%s2437_s5 + $0x118] sm:$0xff] %vm1146_vm2, %v1003_v35 }
 0x1f9   :  { %1181 = vst.msk [vmem:[%s2437_s5 + $0x110] sm:$0xff] %vm1146_vm2, %v998_v37  ;;  %v1613_v38 = vpop.f32.mrb[30].mxu1 }
 0x1fa   :  { %v1013_v39 = vadd.f32 %v1613_v38, %v2110_v29  ;;  %v1007_v40 = vpop.f32.mrb[31].mxu1 }
 0x1fb   :  { %v1008_v41 = vadd.f32 %v2110_v29, %v1007_v40 }
 0x1fc   :  { %1184 = vst.msk [vmem:[%s2437_s5 + $0x128] sm:$0xff] %vm1146_vm2, %v1013_v39 }
 0x1fd   :  { %1183 = vst.msk [vmem:[%s2437_s5 + $0x120] sm:$0xff] %vm1146_vm2, %v1008_v41  ;;  %v1616_v42 = vpop.f32.mrb[32].mxu1 }
 0x1fe   :  { %v1023_v43 = vadd.f32 %v1616_v42, %v2110_v29  ;;  %v1017_v44 = vpop.f32.mrb[33].mxu1 }
 0x1ff   :  { %v1018_v45 = vadd.f32 %v2110_v29, %v1017_v44 }
 0x200   :  { %1186 = vst.msk [vmem:[%s2437_s5 + $0x138] sm:$0xff] %vm1146_vm2, %v1023_v43 }
 0x201   :  { %1185 = vst.msk [vmem:[%s2437_s5 + $0x130] sm:$0xff] %vm1146_vm2, %v1018_v45  ;;  %v1619_v46 = vpop.f32.mrb[34].mxu1 }
 0x202   :  { %v1033_v47 = vadd.f32 %v1619_v46, %v2110_v29  ;;  %v1027_v48 = vpop.f32.mrb[35].mxu1 }
 0x203   :  { %v1028_v49 = vadd.f32 %v2110_v29, %v1027_v48 }
 0x204   :  { %1188 = vst.msk [vmem:[%s2437_s5 + $0x148] sm:$0xff] %vm1146_vm2, %v1033_v47 }
 0x205   :  { %1187 = vst.msk [vmem:[%s2437_s5 + $0x140] sm:$0xff] %vm1146_vm2, %v1028_v49  ;;  %v1622_v50 = vpop.f32.mrb[36].mxu1 }
 0x206   :  { %v1043_v51 = vadd.f32 %v1622_v50, %v2110_v29  ;;  %v1037_v52 = vpop.f32.mrb[37].mxu1 }
 0x207   :  { %v1038_v53 = vadd.f32 %v2110_v29, %v1037_v52 }
 0x208   :  { %1190 = vst.msk [vmem:[%s2437_s5 + $0x158] sm:$0xff] %vm1146_vm2, %v1043_v51 }
 0x209   :  { %1189 = vst.msk [vmem:[%s2437_s5 + $0x150] sm:$0xff] %vm1146_vm2, %v1038_v53  ;;  %v1625_v54 = vpop.f32.mrb[38].mxu1 }
 0x20a   :  { %v1053_v55 = vadd.f32 %v1625_v54, %v2110_v29  ;;  %v1047_v56 = vpop.f32.mrb[39].mxu1 }
 0x20b   :  { %v1048_v57 = vadd.f32 %v2110_v29, %v1047_v56 }
 0x20c   :  { %1192 = vst.msk [vmem:[%s2437_s5 + $0x168] sm:$0xff] %vm1146_vm2, %v1053_v55 }
 0x20d   :  { %1191 = vst.msk [vmem:[%s2437_s5 + $0x160] sm:$0xff] %vm1146_vm2, %v1048_v57  ;;  %v1628_v58 = vpop.f32.mrb[40].mxu1 }
 0x20e   :  { %v1063_v59 = vadd.f32 %v1628_v58, %v2110_v29  ;;  %v1057_v60 = vpop.f32.mrb[41].mxu1 }
 0x20f   :  { %v1058_v61 = vadd.f32 %v2110_v29, %v1057_v60 }
 0x210   :  { %1194 = vst.msk [vmem:[%s2437_s5 + $0x178] sm:$0xff] %vm1146_vm2, %v1063_v59 }
 0x211   :  { %1193 = vst.msk [vmem:[%s2437_s5 + $0x170] sm:$0xff] %vm1146_vm2, %v1058_v61  ;;  %v1631_v62 = vpop.f32.mrb[42].mxu1 }
 0x212   :  { %v1073_v63 = vadd.f32 %v1631_v62, %v2110_v29  ;;  %v1067_v0 = vpop.f32.mrb[43].mxu1 }
 0x213   :  { %v1068_v1 = vadd.f32 %v2110_v29, %v1067_v0 }
 0x214   :  { %1196 = vst.msk [vmem:[%s2437_s5 + $0x188] sm:$0xff] %vm1146_vm2, %v1073_v63 }
 0x215   :  { %1195 = vst.msk [vmem:[%s2437_s5 + $0x180] sm:$0xff] %vm1146_vm2, %v1068_v1  ;;  %v1634_v2 = vpop.f32.mrb[44].mxu1 }
 0x216   :  { %v1083_v3 = vadd.f32 %v1634_v2, %v2110_v29  ;;  %v1077_v4 = vpop.f32.mrb[45].mxu1 }
 0x217   :  { %v1078_v5 = vadd.f32 %v2110_v29, %v1077_v4 }
 0x218   :  { %1198 = vst.msk [vmem:[%s2437_s5 + $0x198] sm:$0xff] %vm1146_vm2, %v1083_v3 }
 0x219   :  { %1197 = vst.msk [vmem:[%s2437_s5 + $0x190] sm:$0xff] %vm1146_vm2, %v1078_v5  ;;  %v1637_v6 = vpop.f32.mrb[46].mxu1 }
 0x21a   :  { %v1093_v7 = vadd.f32 %v1637_v6, %v2110_v29  ;;  %v1087_v8 = vpop.f32.mrb[47].mxu1 }
 0x21b   :  { %v1088_v9 = vadd.f32 %v2110_v29, %v1087_v8 }
 0x21c   :  { %1200 = vst.msk [vmem:[%s2437_s5 + $0x1a8] sm:$0xff] %vm1146_vm2, %v1093_v7 }
 0x21d   :  { %1199 = vst.msk [vmem:[%s2437_s5 + $0x1a0] sm:$0xff] %vm1146_vm2, %v1088_v9  ;;  %v1640_v10 = vpop.f32.mrb[48].mxu1 }
 0x21e   :  { %v1103_v11 = vadd.f32 %v1640_v10, %v2110_v29  ;;  %v1097_v12 = vpop.f32.mrb[49].mxu1 }
 0x21f   :  { %v1098_v13 = vadd.f32 %v2110_v29, %v1097_v12 }
 0x220   :  { %1202 = vst.msk [vmem:[%s2437_s5 + $0x1b8] sm:$0xff] %vm1146_vm2, %v1103_v11 }
 0x221   :  { %1201 = vst.msk [vmem:[%s2437_s5 + $0x1b0] sm:$0xff] %vm1146_vm2, %v1098_v13  ;;  %v1643_v14 = vpop.f32.mrb[50].mxu1 }
 0x222   :  { %v1113_v15 = vadd.f32 %v1643_v14, %v2110_v29  ;;  %v1107_v16 = vpop.f32.mrb[51].mxu1 }
 0x223   :  { %v1108_v17 = vadd.f32 %v2110_v29, %v1107_v16 }
 0x224   :  { %1204 = vst.msk [vmem:[%s2437_s5 + $0x1c8] sm:$0xff] %vm1146_vm2, %v1113_v15 }
 0x225   :  { %1203 = vst.msk [vmem:[%s2437_s5 + $0x1c0] sm:$0xff] %vm1146_vm2, %v1108_v17  ;;  %v1646_v18 = vpop.f32.mrb[52].mxu1 }
 0x226   :  { %v1123_v19 = vadd.f32 %v1646_v18, %v2110_v29  ;;  %v1117_v20 = vpop.f32.mrb[53].mxu1 }
 0x227   :  { %v1118_v21 = vadd.f32 %v2110_v29, %v1117_v20 }
 0x228   :  { %1206 = vst.msk [vmem:[%s2437_s5 + $0x1d8] sm:$0xff] %vm1146_vm2, %v1123_v19 }
 0x229   :  { %1205 = vst.msk [vmem:[%s2437_s5 + $0x1d0] sm:$0xff] %vm1146_vm2, %v1118_v21  ;;  %v1649_v22 = vpop.f32.mrb[54].mxu1 }
 0x22a   :  { %v1133_v23 = vadd.f32 %v1649_v22, %v2110_v29  ;;  %v1127_v24 = vpop.f32.mrb[55].mxu1 }
 0x22b   :  { %v1128_v26 = vadd.f32 %v2110_v29, %v1127_v24 }
 0x22c   :  { %1208 = vst.msk [vmem:[%s2437_s5 + $0x1e8] sm:$0xff] %vm1146_vm2, %v1133_v23 }
 0x22d   :  { %1207 = vst.msk [vmem:[%s2437_s5 + $0x1e0] sm:$0xff] %vm1146_vm2, %v1128_v26  ;;  %v1652_v27 = vpop.f32.mrb[56].mxu1 }
 0x22e   :  { %v1143_v28 = vadd.f32 %v1652_v27, %v2110_v29  ;;  %v1137_v30 = vpop.f32.mrb[57].mxu1 }
 0x22f   :  { %v1138_v31 = vadd.f32 %v2110_v29, %v1137_v30 }
 0x230   :  { %1210 = vst.msk [vmem:[%s2437_s5 + $0x1f8] sm:$0xff] %vm1146_vm2, %v1143_v28 }
 0x231   :  { %1209 = vst.msk [vmem:[%s2437_s5 + $0x1f0] sm:$0xff] %vm1146_vm2, %v1138_v31 }

</bundles_post_ra>
